<compile_context>
chip_gen: v7x
topology: tpu7x:2x2x1
jax: 0.10.0
libtpu: 0.0.40
codegen_flags: <defaults>
</compile_context>

<pallas_src>
import math

import jax
import jax.numpy as jnp
from jax.experimental import pallas as pl
from jax.experimental.pallas import tpu as pltpu


def _ssm_gating_kernel(gate_ref, x_ref, o_ref):
    # gate_ref: (1, Dp) resident tile with tanh(gating_alpha), already x.dtype.
    # x_ref / o_ref: (bm, Dp) tile of the flattened input / output.
    # The (1, Dp) -> (bm, Dp) sublane broadcast is absorbed by VPU slack in an
    # HBM-bound kernel, so no stride-0 tricks are needed.
    o_ref[...] = x_ref[...] * gate_ref[...]


def _cdiv(a, b):
    return -(-a // b)


def ssm_gating(x, gating_alpha, *, target_block_bytes=8 * 1024 * 1024,
               donate_x=False):
    """Compute tanh(gating_alpha) * x for x of shape [..., model_dim]."""
    orig_shape = x.shape
    d = orig_shape[-1]
    assert gating_alpha.shape == (d,), (gating_alpha.shape, d)

    # Hoist tanh out of the kernel; cast to the compute dtype.
    # NOTE: PyTorch (f32 parameter) promotes a bf16 multiply to f32; we keep
    # x.dtype for a pure native-dtype stream (negligible for a tanh gate).
    gate = jnp.tanh(gating_alpha.astype(jnp.float32)).astype(x.dtype)

    x2 = x.reshape(-1, d)            # [rows, d]; contiguous -> free reshape
    rows = x2.shape[0]

    # Lane-dense repack: fold k rows so the last dim is a multiple of 128.
    if d % 128 != 0:
        k = 128 // math.gcd(d, 128)  # == lcm(d, 128) // d
        if k > 1 and rows % k == 0:
            x2 = x2.reshape(rows // k, k * d)
            gate = jnp.tile(gate, k)
        # else: fall back to dp = d (masked partial stores on the lane
        # overhang).  TODO(synk): a lane-dense path for rows % k != 0 would
        # need a padded copy (an extra HBM pass) or a split call; skipped.
    rows_p, dp = x2.shape
    gate2 = gate.reshape(1, dp)

    # Row-block sized by bytes, rounded to the dtype's packed-sublane multiple.
    itemsize = jnp.dtype(x.dtype).itemsize
    sub = max(8, 32 // itemsize)     # 8 for f32, 16 for bf16, 32 for int8/fp8
    bytes_per_row = dp * itemsize
    bm = max(sub, (target_block_bytes // max(1, bytes_per_row)) // sub * sub)
    if bm >= rows_p:
        bm = rows_p                  # single full-extent block (legal)
    grid = _cdiv(rows_p, bm)

    # Small odd grids leave one v7x TensorCore idle for 1/grid of the time:
    # rebalance to an even number of steps when cheaply achievable.
    if 1 < grid <= 8 and grid % 2 == 1:
        bm2 = _cdiv(_cdiv(rows_p, grid + 1), sub) * sub
        grid2 = _cdiv(rows_p, bm2)
        if grid2 % 2 == 0:
            bm, grid = bm2, grid2

    # VMEM: double-buffered (input + output) tiles plus the resident gate row,
    # with 25% slack.  Derived, not hard-coded.
    tile_bytes = bm * dp * itemsize
    vmem_limit = int((2 * 2 * tile_bytes + 2 * dp * itemsize) * 1.25) + (2 << 20)

    out = pl.pallas_call(
        _ssm_gating_kernel,
        out_shape=jax.ShapeDtypeStruct((rows_p, dp), x.dtype),
        grid_spec=pltpu.PrefetchScalarGridSpec(
            num_scalar_prefetch=0,
            grid=(grid,),
            in_specs=[
                pl.BlockSpec((1, dp), lambda i: (0, 0)),    # gate (resident)
                pl.BlockSpec((bm, dp), lambda i: (i, 0)),   # x row-block
            ],
            out_specs=pl.BlockSpec((bm, dp), lambda i: (i, 0)),
        ),
        compiler_params=pltpu.CompilerParams(
            dimension_semantics=("parallel",),
            vmem_limit_bytes=vmem_limit,
        ),
        input_output_aliases=({1: 0} if donate_x else {}),
    )(gate2, x2)

    return out.reshape(orig_shape)


if __name__ == "__main__":
    # Synthetic config matching the module: model_dim=32, gating_alpha_init=0.1
    model_dim = 32
    gating_alpha_init = 0.1
    batch, seq = 2, 8

    key = jax.random.PRNGKey(0)
    x = jax.random.normal(key, (batch, seq, model_dim), dtype=jnp.float32)
    gating_alpha = jnp.ones((model_dim,), dtype=jnp.float32) * gating_alpha_init

    out = jax.block_until_ready(ssm_gating(x, gating_alpha))
    ref = jnp.tanh(gating_alpha) * x
    assert out.shape == x.shape
    assert jnp.allclose(out, ref, atol=1e-6, rtol=1e-6)

    # Donation / aliasing path (same semantics, aliases x's buffer in the call).
    out_d = jax.block_until_ready(ssm_gating(x, gating_alpha, donate_x=True))
    assert jnp.allclose(out_d, ref, atol=1e-6, rtol=1e-6)

    # Multi-step grid + odd->even rebalance + clipped partial last block.
    d2 = 256
    x_b = jax.random.normal(jax.random.PRNGKey(1), (3, 100, d2), dtype=jnp.float32)
    alpha_b = jax.random.normal(jax.random.PRNGKey(2), (d2,), dtype=jnp.float32) * 0.1
    out_b = jax.block_until_ready(
        ssm_gating(x_b, alpha_b, target_block_bytes=48 * 1024))
    ref_b = jnp.tanh(alpha_b) * x_b
    assert out_b.shape == x_b.shape
    assert jnp.allclose(out_b, ref_b, atol=1e-6, rtol=1e-6)

    # bf16 + non-power-of-two model_dim (d=96 -> fold 4 rows -> 384 lanes),
    # exercising the dtype-aware sublane rounding and the lcm-based repack.
    d3 = 96
    x_c = jax.random.normal(jax.random.PRNGKey(3), (4, 8, d3)).astype(jnp.bfloat16)
    alpha_c = jax.random.normal(jax.random.PRNGKey(4), (d3,), dtype=jnp.float32) * 0.1
    out_c = jax.block_until_ready(ssm_gating(x_c, alpha_c))
    ref_c = (jnp.tanh(alpha_c).astype(jnp.bfloat16) * x_c).astype(jnp.float32)
    assert out_c.dtype == jnp.bfloat16
    assert jnp.allclose(out_c.astype(jnp.float32), ref_c, atol=2e-2, rtol=2e-2)

    print("KERNEL_OK")
</pallas_src>

<mosaic_0001>
module attributes {stable_mosaic.version = 11 : i64} {
  func.func @_ssm_gating_kernel(%arg0: i32, %arg1: memref<1x128xf32, #tpu.memory_space<vmem>>, %arg2: memref<4x128xf32, #tpu.memory_space<vmem>>, %arg3: memref<4x128xf32, #tpu.memory_space<vmem>>) attributes {dimension_semantics = [#tpu.dimension_semantics<parallel>], iteration_bounds = array<i64: 1>, scalar_prefetch = 0 : i64, scratch_operands = 0 : i64, tpu.core_type = #tpu.core_type<tc>, window_params = [{pipeline_mode = #tpu.pipeline_mode<synchronous>, transform_indices = @transform_0, window_bounds = array<i64: 1, 128>}, {transform_indices = @transform_1, window_bounds = array<i64: 4, 128>}, {transform_indices = @transform_2, window_bounds = array<i64: 4, 128>}]} {
    %c0 = arith.constant 0 : index
    %c0_0 = arith.constant 0 : index
    %0 = vector.load %arg2[%c0, %c0_0] : memref<4x128xf32, #tpu.memory_space<vmem>>, vector<4x128xf32>
    %c0_1 = arith.constant 0 : index
    %c0_2 = arith.constant 0 : index
    %1 = vector.load %arg1[%c0_1, %c0_2] : memref<1x128xf32, #tpu.memory_space<vmem>>, vector<1x128xf32>
    %2 = vector.broadcast %1 : vector<1x128xf32> to vector<4x128xf32>
    %3 = arith.mulf %0, %2 : vector<4x128xf32>
    %c0_3 = arith.constant 0 : index
    %c0_4 = arith.constant 0 : index
    %4 = vector.load %arg3[%c0_3, %c0_4] : memref<4x128xf32, #tpu.memory_space<vmem>>, vector<4x128xf32>
    tpu.vector_store %arg3[%c0_3, %c0_4], %3 {strides = array<i32>} : memref<4x128xf32, #tpu.memory_space<vmem>>, vector<4x128xf32>,
    return
  }
  func.func @transform_0(%arg0: i32) -> (i32, i32) {
    %c0_i32 = arith.constant 0 : i32
    %c0_i32_0 = arith.constant 0 : i32
    %c0_i32_1 = arith.constant 0 : i32
    return %c0_i32, %c0_i32_0 : i32, i32
  }
  func.func @transform_1(%arg0: i32) -> (i32, i32) {
    %c0_i32 = arith.constant 0 : i32
    %c0_i32_0 = arith.constant 0 : i32
    return %arg0, %c0_i32 : i32, i32
  }
  func.func @transform_2(%arg0: i32) -> (i32, i32) {
    %c0_i32 = arith.constant 0 : i32
    %c0_i32_0 = arith.constant 0 : i32
    return %arg0, %c0_i32 : i32, i32
  }
}

</mosaic_0001>

<bundles_post_ra>
// kernel: tpu_custom_call.1
= control target key start
LH: loop header
LB: loop body
LE: loop exit
PB: predicated region body
PF: predicated region fallthrough
CT: control target
= control target key end

     0   :  { %7 = vsyncpa [#allocation3], 0  ;;  %s192_s0 = inlined_call_operand.hbm [shape: f32[1,128], index: 0, kind: input, shape index: {}]   ;;  %s193_s1 = inlined_call_operand.hbm [shape: f32[4,128], index: 1, kind: input, shape index: {}]   ;;  %s194_s2 = inlined_call_operand.hbm [shape: f32[4,128], index: 2, kind: output, shape index: {}]  }
   0x1   :  { %8 = vsyncpa [#allocation6], 0 }
   0x2   :  { %9 = vsyncpa [#allocation4], 0  ;;  %s138_s9 = smov [#allocation2]   ;;  %s139_s11 = smov [#allocation5]  }
   0x3   :  { %s16_s10 = sshll.u32 %s138_s9, 4  ;;  %s26_s12 = sshll.u32 %s139_s11, 4  ;;  %s17_s10 = int_to_ptr.vmem [resolvable:$true] %s16_s10  ;;  %s27_s12 = int_to_ptr.vmem [resolvable:$true] %s26_s12 }
   0x4   :  { %s66_s15 = scalar_lea.hbm %s192_s0, 16 }
   0x5   :  { %p67_p0 = scmp.ne.s32.totalorder %s192_s0, %s66_s15  ;;  %p70_p1 = scmp.lt.u32.totalorder %s66_s15, %s192_s0 }
   0x7   :  { %p72_p2 = pnand %p70_p1, %p67_p0 }
   0x9   :  { %75 = shalt.err (!%p72_p2)
}
   0xa   :  { %s76_s20 = scalar_lea.vmem %s17_s10, 16  ;;  %s80_s21 = scalar_lea.vmem %s17_s10, 32 }
   0xb   :  { %p77_p3 = scmp.ne.s32.totalorder %s17_s10, %s76_s20  ;;  %p81_p4 = scmp.lt.s32.totalorder %s17_s10, %s17_s10 }
   0xc   :  { %p82_p5 = scmp.lt.s32.totalorder %s80_s21, %s76_s20 }
   0xe   :  { %p83_p6 = por %p82_p5, %p81_p4 }
  0x10   :  { %p84_p7 = pnand %p83_p6, %p77_p3 }
  0x12   :  { %87 = shalt.err (!%p84_p7)
}
  0x13   :  { %19 = dma.hbm_to_vmem [thread:$0]  %s192_s0, 16, %s17_s10, [#allocation3]  }
  0x14   :  { %s88_s26 = scalar_lea.hbm %s193_s1, 64 }
  0x15   :  { %p89_p8 = scmp.ne.s32.totalorder %s193_s1, %s88_s26  ;;  %p92_p9 = scmp.lt.u32.totalorder %s88_s26, %s193_s1 }
  0x17   :  { %p94_p10 = pnand %p92_p9, %p89_p8 }
  0x19   :  { %97 = shalt.err (!%p94_p10)
}
  0x1a   :  { %s98_s3 = scalar_lea.vmem %s27_s12, 64  ;;  %p103_p12 = scmp.lt.s32.totalorder %s27_s12, %s27_s12 }
  0x1b   :  { %p99_p11 = scmp.ne.s32.totalorder %s27_s12, %s98_s3  ;;  %p104_p13 = scmp.lt.s32.totalorder %s98_s3, %s98_s3 }
  0x1d   :  { %p105_p0 = por %p104_p13, %p103_p12 }
  0x1f   :  { %p106_p1 = pnand %p105_p0, %p99_p11 }
  0x21   :  { %109 = shalt.err (!%p106_p1)
}
  0x22   :  { %29 = dma.hbm_to_vmem [thread:$0]  %s193_s1, 64, %s27_s12, [#allocation6]  }
  0x23   :  { %132 = dma.done.wait [#allocation3], 16  }
  0x24   :  { %133 = vsyncadd [#allocation3], 4294967280 }
  0x25   :  { %134 = dma.done.wait [#allocation6], 64  }
  0x26   :  { %135 = vsyncadd [#allocation6], 4294967232  ;;  %s140_s5 = smov [#allocation7]   ;;  %v36_v0 = vld [vmem:[#allocation5] sm:$0xf] }
  0x27   :  { %s52_s6 = sshll.u32 %s140_s5, 4  ;;  %v62_v1 = vld [vmem:[#allocation2] ss:$0 sm:$0xff]  ;;  %s53_s6 = int_to_ptr.vmem [resolvable:$true] %s52_s6 }
  0x28   :  { %v44_v2 = vmul.f32 %v62_v1, %v36_v0  ;;  %s110_s7 = scalar_lea.vmem %s53_s6, 64  ;;  %p115_p3 = scmp.lt.s32.totalorder %s53_s6, %s53_s6 }
  0x29   :  { %p111_p2 = scmp.ne.s32.totalorder %s53_s6, %s110_s7  ;;  %p116_p4 = scmp.lt.s32.totalorder %s110_s7, %s110_s7 }
  0x2a   :  { %45 = vst [vmem:[#allocation7] sm:$0xf] %v44_v2 }
  0x2b   :  { %p117_p5 = por %p116_p4, %p115_p3 }
  0x2d   :  { %p118_p6 = pnand %p117_p5, %p111_p2 }
  0x2f   :  { %121 = shalt.err (!%p118_p6)
}
  0x30   :  { %s122_s9 = scalar_lea.hbm %s194_s2, 64 }
  0x31   :  { %p123_p7 = scmp.ne.s32.totalorder %s194_s2, %s122_s9  ;;  %p126_p8 = scmp.lt.u32.totalorder %s122_s9, %s194_s2 }
  0x33   :  { %p128_p9 = pnand %p126_p8, %p123_p7 }
  0x35   :  { %131 = shalt.err (!%p128_p9)
}
  0x36   :  { %55 = dma.vmem_to_hbm [thread:$0]  %s53_s6, 64, %s194_s2, [#allocation4]  }
  0x37   :  { %136 = dma.done.wait [#allocation4], 64  }
  0x38   :  { %137 = vsyncadd [#allocation4], 4294967232 }
  0x39   :  { %59 = vsyncpa [#allocation3], 1 }
  0x3a   :  { %60 = vsyncpa [#allocation6], 1 }
  0x3b   :  { %61 = vsyncpa [#allocation4], 1 }

</bundles_post_ra>
